<compile_context>
chip_gen: v5e
topology: v5e:2x2
jax: 0.10.0
libtpu: 0.0.40
codegen_flags: <defaults>
</compile_context>

<pallas_src>
import functools

import jax
import jax.numpy as jnp
from jax.experimental import pallas as pl
from jax.experimental.pallas import tpu as pltpu


# Row layout of the packed head-weight slab (all offsets sublane-aligned).
_W1E_LO, _W1E_HI = 0, 256      # fc1 weights for encoder features   (256, 128)
_W1X_LO, _W1X_HI = 256, 264    # fc1 weights for 7 extras, row 7 = 0 (8, 128)
_W2_LO, _W2_HI = 264, 392      # fc2 (128, 64) zero-padded to       (128, 128)
_W3_LO, _W3_HI = 392, 520      # fc3 (64, out) zero-padded to       (128, out_pad)
_HEAD_ROWS = 520


def _round_up(n, m):
    return ((n + m - 1) // m) * m


def _choose_tiling(batch):
    """Return (padded_batch, tile_rows) for the row grid."""
    pB = _round_up(max(batch, 1), 8)
    if pB <= 8:
        return pB, pB
    # Largest multiple-of-8 tile dividing pB, capped at 512 rows (VMEM is not
    # the constraint) and at pB//2 so the grid has >= 2 steps (v7x megacore).
    cap = max(8, min(512, pB // 2))
    tile = 8
    for t in range(8, cap + 1, 8):
        if pB % t == 0:
            tile = t
    if pB // tile > 8:
        # Awkward batch (e.g. 136): divisor tiling would need many tiny
        # steps; pad a little instead and take a few larger steps.
        tile = max(8, min(512, _round_up(-(-pB // 2), 8)))
        pB = _round_up(pB, tile)
    return pB, tile


def _make_kernel(out_pad, flat_pad):
    b3_lo = 512
    b_dec_lo = 512 + out_pad

    def kernel(board_ref, extras_ref, w_enc_ref, head_ref, bias_ref, w_dec_ref,
               q_out_ref, recon_out_ref):
        cdt = w_enc_ref.dtype  # MXU operand dtype (bf16 by default)

        b_enc = bias_ref[:, 0:256]
        b1 = bias_ref[:, 256:384]
        b2 = bias_ref[:, 384:512]
        b3 = bias_ref[:, b3_lo:b3_lo + out_pad]
        b_dec = bias_ref[:, b_dec_lo:b_dec_lo + flat_pad]

        # encoder: Linear(flat, 256) + ReLU   (f32 accumulation on the MXU)
        board = board_ref[...].astype(cdt)
        enc = jnp.dot(board, w_enc_ref[...], preferred_element_type=jnp.float32)
        enc = jnp.maximum(enc + b_enc, 0.0)
        enc_c = enc.astype(cdt)

        # decoder: Linear(256, flat) + Sigmoid.  Kept adjacent to the encoder
        # dot so the two MXU-heavy matmuls go back-to-back; the tiny fc head
        # below is VPU/EUP filler the scheduler can overlap.
        rec = jnp.dot(enc_c, w_dec_ref[...], preferred_element_type=jnp.float32)
        recon_out_ref[...] = jax.nn.sigmoid(rec + b_dec).astype(recon_out_ref.dtype)

        # fc head on concat([encoded, extras]) expressed as two aligned dots.
        extras = extras_ref[...].astype(cdt)
        h1 = (
            jnp.dot(enc_c, head_ref[_W1E_LO:_W1E_HI, 0:128],
                    preferred_element_type=jnp.float32)
            + jnp.dot(extras, head_ref[_W1X_LO:_W1X_HI, 0:128],
                      preferred_element_type=jnp.float32)
            + b1
        )
        h1 = jnp.maximum(h1, 0.0).astype(cdt)
        h2 = jnp.maximum(
            jnp.dot(h1, head_ref[_W2_LO:_W2_HI, 0:128],
                    preferred_element_type=jnp.float32) + b2,
            0.0,
        ).astype(cdt)
        q = jnp.dot(h2, head_ref[_W3_LO:_W3_HI, 0:out_pad],
                    preferred_element_type=jnp.float32) + b3
        q_out_ref[...] = q.astype(q_out_ref.dtype)

    return kernel


def prepare_weights(params, board_size, output_size, weight_dtype=jnp.bfloat16):
    """One-time operand packing: pad to lane-dense widths, split w1, pack the
    head matrices and all biases into single slabs, cast to weight_dtype.
    Call this ONCE whenever `params` change — NOT on every forward."""
    in_channels = 3
    flat_size = in_channels * board_size[0] * board_size[1]
    flat_pad = _round_up(flat_size, 128)
    out_pad = _round_up(max(output_size, 1), 128)

    w_enc = params["w_enc"].astype(weight_dtype)                     # (flat, 256)

    head = jnp.zeros((_HEAD_ROWS, out_pad), jnp.float32)
    head = head.at[_W1E_LO:_W1E_HI, 0:128].set(params["w1"][:256, :])
    head = head.at[_W1X_LO:_W1X_LO + 7, 0:128].set(params["w1"][256:, :])
    head = head.at[_W2_LO:_W2_HI, 0:64].set(params["w2"])
    head = head.at[_W3_LO:_W3_LO + 64, 0:output_size].set(params["w3"])
    head = head.astype(weight_dtype)

    bias_w = 512 + out_pad + flat_pad
    bias = jnp.zeros((1, bias_w), jnp.float32)
    bias = bias.at[:, 0:256].set(params["b_enc"])
    bias = bias.at[:, 256:384].set(params["b1"])
    bias = bias.at[:, 384:448].set(params["b2"])
    bias = bias.at[:, 512:512 + output_size].set(params["b3"])
    bias = bias.at[:, 512 + out_pad:512 + out_pad + flat_size].set(params["b_dec"])

    w_dec = (
        jnp.zeros((256, flat_pad), jnp.float32)
        .at[:, :flat_size].set(params["w_dec"])
        .astype(weight_dtype)
    )

    return {"w_enc": w_enc, "head": head, "bias": bias, "w_dec": w_dec}


@functools.partial(jax.jit,
                   static_argnames=("board_size", "output_size", "recon_dtype"))
def conv_network_forward(x, prepared, board_size, output_size,
                         recon_dtype=jnp.bfloat16):
    """Fused ConvNetwork forward.

    x: (B, 3*H*W + 7) float32; `prepared` comes from prepare_weights(params,...)
    returns: (q_values (B, output_size) f32, recon (B, 3, H, W) recon_dtype)
    """
    in_channels = 3
    H, W = board_size
    flat_size = in_channels * H * W
    B = x.shape[0]
    assert x.shape[1] == flat_size + 7

    flat_pad = _round_up(flat_size, 128)
    out_pad = _round_up(max(output_size, 1), 128)
    pB, tile_b = _choose_tiling(B)

    board = x[:, :flat_size]
    extras = x[:, flat_size:]
    # extras padded 7 -> 8 lanes (row 7 of the packed w1x slab is zero);
    # row padding only materialized when the batch isn't already aligned.
    if pB != B:
        board = jnp.pad(board, ((0, pB - B), (0, 0)))
        extras = jnp.pad(extras, ((0, pB - B), (0, 1)))
    else:
        extras = jnp.pad(extras, ((0, 0), (0, 1)))

    operands = (board, extras, prepared["w_enc"], prepared["head"],
                prepared["bias"], prepared["w_dec"])

    grid = (pB // tile_b,)

    # Row-tiled activation specs + grid-invariant (VMEM-resident) weight specs.
    in_specs = [
        pl.BlockSpec((tile_b, flat_size), lambda i: (i, 0)),
        pl.BlockSpec((tile_b, 8), lambda i: (i, 0)),
        pl.BlockSpec(prepared["w_enc"].shape, lambda i: (0, 0)),
        pl.BlockSpec(prepared["head"].shape, lambda i: (0, 0)),
        pl.BlockSpec(prepared["bias"].shape, lambda i: (0, 0)),
        pl.BlockSpec(prepared["w_dec"].shape, lambda i: (0, 0)),
    ]
    out_shapes = (
        jax.ShapeDtypeStruct((pB, out_pad), jnp.float32),
        jax.ShapeDtypeStruct((pB, flat_pad), recon_dtype),
    )
    out_specs = (
        pl.BlockSpec((tile_b, out_pad), lambda i: (i, 0)),
        pl.BlockSpec((tile_b, flat_pad), lambda i: (i, 0)),
    )

    flops = 2 * pB * (
        flat_size * 256        # encoder
        + 256 * flat_pad       # decoder
        + 256 * 128 + 8 * 128  # fc1 (split)
        + 128 * 128            # fc2 (padded)
        + 128 * out_pad        # fc3 (padded)
    )
    bytes_accessed = int(
        sum(int(op.size) * op.dtype.itemsize for op in operands)
        + pB * out_pad * 4
        + pB * flat_pad * jnp.dtype(recon_dtype).itemsize
    )
    cost = pl.CostEstimate(
        flops=flops,
        transcendentals=pB * flat_pad,  # sigmoid
        bytes_accessed=bytes_accessed,
    )

    q_pad, recon_pad = pl.pallas_call(
        _make_kernel(out_pad, flat_pad),
        out_shape=out_shapes,
        grid=grid,
        in_specs=in_specs,
        out_specs=out_specs,
        compiler_params=pltpu.CompilerParams(dimension_semantics=("parallel",)),
        cost_estimate=cost,
    )(*operands)

    q_values = q_pad[:B, :output_size]
    recon = recon_pad[:B, :flat_size].reshape(B, in_channels, H, W)
    return q_values, recon


def init_params(key, board_size, output_size):
    """Deterministic synthetic parameters (PyTorch Linear shapes, pre-transposed)."""
    in_channels = 3
    flat_size = in_channels * board_size[0] * board_size[1]

    def linear(key, fan_in, fan_out):
        k_w, k_b = jax.random.split(key)
        bound = 1.0 / jnp.sqrt(fan_in)
        # stored as (in, out) so forward does x @ W directly (== x @ W_torch.T)
        w = jax.random.uniform(k_w, (fan_in, fan_out), jnp.float32, -bound, bound)
        b = jax.random.uniform(k_b, (1, fan_out), jnp.float32, -bound, bound)
        return w, b

    keys = jax.random.split(key, 5)
    w_enc, b_enc = linear(keys[0], flat_size, 256)
    w1, b1 = linear(keys[1], 256 + 7, 128)
    w2, b2 = linear(keys[2], 128, 64)
    w3, b3 = linear(keys[3], 64, output_size)
    w_dec, b_dec = linear(keys[4], 256, flat_size)
    return {
        "w_enc": w_enc, "b_enc": b_enc,
        "w1": w1, "b1": b1,
        "w2": w2, "b2": b2,
        "w3": w3, "b3": b3,
        "w_dec": w_dec, "b_dec": b_dec,
    }


def reference_forward(x, params, board_size, output_size):
    """Pure-JAX f32 reference matching the PyTorch module semantics."""
    flat_size = 3 * board_size[0] * board_size[1]
    board = x[:, :flat_size]
    extras = x[:, flat_size:]
    enc = jnp.maximum(board @ params["w_enc"] + params["b_enc"], 0.0)
    cat = jnp.concatenate([enc, extras], axis=1)
    h1 = jnp.maximum(cat @ params["w1"] + params["b1"], 0.0)
    h2 = jnp.maximum(h1 @ params["w2"] + params["b2"], 0.0)
    q = h2 @ params["w3"] + params["b3"]
    rec = jax.nn.sigmoid(enc @ params["w_dec"] + params["b_dec"])
    return q, rec.reshape(x.shape[0], 3, *board_size)


if __name__ == "__main__":
    BOARD_SIZE = (8, 8)
    OUTPUT_SIZE = 4
    FLAT = 3 * BOARD_SIZE[0] * BOARD_SIZE[1]

    key = jax.random.PRNGKey(0)
    k_params, k_x1, k_x2 = jax.random.split(key, 3)
    params = init_params(k_params, BOARD_SIZE, OUTPUT_SIZE)
    # One-time operand packing (hoisted out of the per-call path).
    prepared = prepare_weights(params, BOARD_SIZE, OUTPUT_SIZE)

    for batch, k_x in ((4, k_x1), (32, k_x2)):
        x = jax.random.normal(k_x, (batch, FLAT + 7), jnp.float32)
        q_values, recon = conv_network_forward(
            x, prepared, board_size=BOARD_SIZE, output_size=OUTPUT_SIZE)
        jax.block_until_ready((q_values, recon))

        q_ref, recon_ref = reference_forward(x, params, BOARD_SIZE, OUTPUT_SIZE)
        assert q_values.shape == (batch, OUTPUT_SIZE)
        assert recon.shape == (batch, 3, BOARD_SIZE[0], BOARD_SIZE[1])
        # Tolerances loosened for bf16 weight storage + bf16 recon output
        # (f32 accumulation on the MXU).
        assert jnp.allclose(q_values, q_ref, atol=3e-2, rtol=3e-2)
        assert jnp.allclose(recon.astype(jnp.float32), recon_ref,
                            atol=3e-2, rtol=3e-2)

    print("KERNEL_OK")
</pallas_src>

<mosaic_0001>
module attributes {stable_mosaic.version = 11 : i64} {
  func.func @kernel(%arg0: i32, %arg1: memref<8x192xf32, #tpu.memory_space<vmem>>, %arg2: memref<8x8xf32, #tpu.memory_space<vmem>>, %arg3: memref<192x256xbf16, #tpu.memory_space<vmem>>, %arg4: memref<520x128xbf16, #tpu.memory_space<vmem>>, %arg5: memref<1x896xf32, #tpu.memory_space<vmem>>, %arg6: memref<256x256xbf16, #tpu.memory_space<vmem>>, %arg7: memref<8x128xf32, #tpu.memory_space<vmem>>, %arg8: memref<8x256xbf16, #tpu.memory_space<vmem>>) attributes {dimension_semantics = [#tpu.dimension_semantics<parallel>], iteration_bounds = array<i64: 1>, scalar_prefetch = 0 : i64, scratch_operands = 0 : i64, tpu.core_type = #tpu.core_type<tc>, window_params = [{transform_indices = @transform_0, window_bounds = array<i64: 8, 192>}, {transform_indices = @transform_1, window_bounds = array<i64: 8, 8>}, {pipeline_mode = #tpu.pipeline_mode<synchronous>, transform_indices = @transform_2, window_bounds = array<i64: 192, 256>}, {pipeline_mode = #tpu.pipeline_mode<synchronous>, transform_indices = @transform_3, window_bounds = array<i64: 520, 128>}, {pipeline_mode = #tpu.pipeline_mode<synchronous>, transform_indices = @transform_4, window_bounds = array<i64: 1, 896>}, {pipeline_mode = #tpu.pipeline_mode<synchronous>, transform_indices = @transform_5, window_bounds = array<i64: 256, 256>}, {transform_indices = @transform_6, window_bounds = array<i64: 8, 128>}, {transform_indices = @transform_7, window_bounds = array<i64: 8, 256>}]} {
    %c0 = arith.constant 0 : index
    %c0_0 = arith.constant 0 : index
    %0 = vector.load %arg5[%c0, %c0_0] : memref<1x896xf32, #tpu.memory_space<vmem>>, vector<1x256xf32>
    %c0_1 = arith.constant 0 : index
    %c256 = arith.constant 256 : index
    %1 = vector.load %arg5[%c0_1, %c256] : memref<1x896xf32, #tpu.memory_space<vmem>>, vector<1x128xf32>
    %c0_2 = arith.constant 0 : index
    %c384 = arith.constant 384 : index
    %2 = vector.load %arg5[%c0_2, %c384] : memref<1x896xf32, #tpu.memory_space<vmem>>, vector<1x128xf32>
    %c0_3 = arith.constant 0 : index
    %c512 = arith.constant 512 : index
    %3 = vector.load %arg5[%c0_3, %c512] : memref<1x896xf32, #tpu.memory_space<vmem>>, vector<1x128xf32>
    %c0_4 = arith.constant 0 : index
    %c640 = arith.constant 640 : index
    %4 = vector.load %arg5[%c0_4, %c640] : memref<1x896xf32, #tpu.memory_space<vmem>>, vector<1x256xf32>
    %c0_5 = arith.constant 0 : index
    %c0_6 = arith.constant 0 : index
    %5 = vector.load %arg1[%c0_5, %c0_6] : memref<8x192xf32, #tpu.memory_space<vmem>>, vector<8x192xf32>
    %6 = arith.truncf %5 : vector<8x192xf32> to vector<8x192xbf16>
    %c0_7 = arith.constant 0 : index
    %c0_8 = arith.constant 0 : index
    %7 = vector.load %arg3[%c0_7, %c0_8] : memref<192x256xbf16, #tpu.memory_space<vmem>>, vector<192x256xbf16>
    %cst = arith.constant dense<0.000000e+00> : vector<8x256xf32>
    %8 = tpu.matmul %6, %7, %cst {dimension_numbers = #tpu.dot_dimension_numbers<[1], [0], [0], [1], [0, 0, 1, 1], [], []>} : vector<8x192xbf16>, vector<192x256xbf16>, vector<8x256xf32> -> vector<8x256xf32>
    %9 = vector.broadcast %0 : vector<1x256xf32> to vector<8x256xf32>
    %10 = arith.addf %8, %9 : vector<8x256xf32>
    %cst_9 = arith.constant 0.000000e+00 : f32
    %11 = vector.broadcast %cst_9 : f32 to vector<8x256xf32>
    %12 = arith.maximumf %10, %11 : vector<8x256xf32>
    %13 = arith.truncf %12 : vector<8x256xf32> to vector<8x256xbf16>
    %c0_10 = arith.constant 0 : index
    %c0_11 = arith.constant 0 : index
    %14 = vector.load %arg6[%c0_10, %c0_11] : memref<256x256xbf16, #tpu.memory_space<vmem>>, vector<256x256xbf16>
    %cst_12 = arith.constant dense<0.000000e+00> : vector<8x256xf32>
    %15 = tpu.matmul %13, %14, %cst_12 {dimension_numbers = #tpu.dot_dimension_numbers<[1], [0], [0], [1], [0, 0, 1, 1], [], []>} : vector<8x256xbf16>, vector<256x256xbf16>, vector<8x256xf32> -> vector<8x256xf32>
    %16 = vector.broadcast %4 : vector<1x256xf32> to vector<8x256xf32>
    %17 = arith.addf %15, %16 : vector<8x256xf32>
    %18 = arith.negf %17 : vector<8x256xf32>
    %19 = math.exp %18 : vector<8x256xf32>
    %cst_13 = arith.constant 1.000000e+00 : f32
    %20 = vector.broadcast %cst_13 : f32 to vector<8x256xf32>
    %21 = arith.addf %20, %19 : vector<8x256xf32>
    %22 = arith.divf %20, %21 : vector<8x256xf32>
    %23 = arith.truncf %22 : vector<8x256xf32> to vector<8x256xbf16>
    %c0_14 = arith.constant 0 : index
    %c0_15 = arith.constant 0 : index
    %24 = vector.load %arg8[%c0_14, %c0_15] : memref<8x256xbf16, #tpu.memory_space<vmem>>, vector<8x256xbf16>
    tpu.vector_store %arg8[%c0_14, %c0_15], %23 {strides = array<i32>} : memref<8x256xbf16, #tpu.memory_space<vmem>>, vector<8x256xbf16>,
    %c0_16 = arith.constant 0 : index
    %c0_17 = arith.constant 0 : index
    %25 = vector.load %arg2[%c0_16, %c0_17] : memref<8x8xf32, #tpu.memory_space<vmem>>, vector<8x8xf32>
    %26 = arith.truncf %25 : vector<8x8xf32> to vector<8x8xbf16>
    %c0_18 = arith.constant 0 : index
    %c0_19 = arith.constant 0 : index
    %27 = vector.load %arg4[%c0_18, %c0_19] : memref<520x128xbf16, #tpu.memory_space<vmem>>, vector<256x128xbf16>
    %cst_20 = arith.constant dense<0.000000e+00> : vector<8x128xf32>
    %28 = tpu.matmul %13, %27, %cst_20 {dimension_numbers = #tpu.dot_dimension_numbers<[1], [0], [0], [1], [0, 0, 1, 1], [], []>} : vector<8x256xbf16>, vector<256x128xbf16>, vector<8x128xf32> -> vector<8x128xf32>
    %c256_21 = arith.constant 256 : index
    %c0_22 = arith.constant 0 : index
    %29 = vector.load %arg4[%c256_21, %c0_22] : memref<520x128xbf16, #tpu.memory_space<vmem>>, vector<8x128xbf16>
    %cst_23 = arith.constant dense<0.000000e+00> : vector<8x128xf32>
    %30 = tpu.matmul %26, %29, %cst_23 {dimension_numbers = #tpu.dot_dimension_numbers<[1], [0], [0], [1], [0, 0, 1, 1], [], []>} : vector<8x8xbf16>, vector<8x128xbf16>, vector<8x128xf32> -> vector<8x128xf32>
    %31 = arith.addf %28, %30 : vector<8x128xf32>
    %32 = vector.broadcast %1 : vector<1x128xf32> to vector<8x128xf32>
    %33 = arith.addf %31, %32 : vector<8x128xf32>
    %cst_24 = arith.constant 0.000000e+00 : f32
    %34 = vector.broadcast %cst_24 : f32 to vector<8x128xf32>
    %35 = arith.maximumf %33, %34 : vector<8x128xf32>
    %36 = arith.truncf %35 : vector<8x128xf32> to vector<8x128xbf16>
    %c264 = arith.constant 264 : index
    %c0_25 = arith.constant 0 : index
    %37 = vector.load %arg4[%c264, %c0_25] : memref<520x128xbf16, #tpu.memory_space<vmem>>, vector<128x128xbf16>
    %cst_26 = arith.constant dense<0.000000e+00> : vector<8x128xf32>
    %38 = tpu.matmul %36, %37, %cst_26 {dimension_numbers = #tpu.dot_dimension_numbers<[1], [0], [0], [1], [0, 0, 1, 1], [], []>} : vector<8x128xbf16>, vector<128x128xbf16>, vector<8x128xf32> -> vector<8x128xf32>
    %39 = vector.broadcast %2 : vector<1x128xf32> to vector<8x128xf32>
    %40 = arith.addf %38, %39 : vector<8x128xf32>
    %cst_27 = arith.constant 0.000000e+00 : f32
    %41 = vector.broadcast %cst_27 : f32 to vector<8x128xf32>
    %42 = arith.maximumf %40, %41 : vector<8x128xf32>
    %43 = arith.truncf %42 : vector<8x128xf32> to vector<8x128xbf16>
    %c392 = arith.constant 392 : index
    %c0_28 = arith.constant 0 : index
    %44 = vector.load %arg4[%c392, %c0_28] : memref<520x128xbf16, #tpu.memory_space<vmem>>, vector<128x128xbf16>
    %cst_29 = arith.constant dense<0.000000e+00> : vector<8x128xf32>
    %45 = tpu.matmul %43, %44, %cst_29 {dimension_numbers = #tpu.dot_dimension_numbers<[1], [0], [0], [1], [0, 0, 1, 1], [], []>} : vector<8x128xbf16>, vector<128x128xbf16>, vector<8x128xf32> -> vector<8x128xf32>
    %46 = vector.broadcast %3 : vector<1x128xf32> to vector<8x128xf32>
    %47 = arith.addf %45, %46 : vector<8x128xf32>
    %c0_30 = arith.constant 0 : index
    %c0_31 = arith.constant 0 : index
    %48 = vector.load %arg7[%c0_30, %c0_31] : memref<8x128xf32, #tpu.memory_space<vmem>>, vector<8x128xf32>
    tpu.vector_store %arg7[%c0_30, %c0_31], %47 {strides = array<i32>} : memref<8x128xf32, #tpu.memory_space<vmem>>, vector<8x128xf32>,
    return
  }
  func.func @transform_0(%arg0: i32) -> (i32, i32) {
    %c0_i32 = arith.constant 0 : i32
    %c0_i32_0 = arith.constant 0 : i32
    return %arg0, %c0_i32 : i32, i32
  }
  func.func @transform_1(%arg0: i32) -> (i32, i32) {
    %c0_i32 = arith.constant 0 : i32
    %c0_i32_0 = arith.constant 0 : i32
    return %arg0, %c0_i32 : i32, i32
  }
  func.func @transform_2(%arg0: i32) -> (i32, i32) {
    %c0_i32 = arith.constant 0 : i32
    %c0_i32_0 = arith.constant 0 : i32
    %c0_i32_1 = arith.constant 0 : i32
    return %c0_i32, %c0_i32_0 : i32, i32
  }
  func.func @transform_3(%arg0: i32) -> (i32, i32) {
    %c0_i32 = arith.constant 0 : i32
    %c0_i32_0 = arith.constant 0 : i32
    %c0_i32_1 = arith.constant 0 : i32
    return %c0_i32, %c0_i32_0 : i32, i32
  }
  func.func @transform_4(%arg0: i32) -> (i32, i32) {
    %c0_i32 = arith.constant 0 : i32
    %c0_i32_0 = arith.constant 0 : i32
    %c0_i32_1 = arith.constant 0 : i32
    return %c0_i32, %c0_i32_0 : i32, i32
  }
  func.func @transform_5(%arg0: i32) -> (i32, i32) {
    %c0_i32 = arith.constant 0 : i32
    %c0_i32_0 = arith.constant 0 : i32
    %c0_i32_1 = arith.constant 0 : i32
    return %c0_i32, %c0_i32_0 : i32, i32
  }
  func.func @transform_6(%arg0: i32) -> (i32, i32) {
    %c0_i32 = arith.constant 0 : i32
    %c0_i32_0 = arith.constant 0 : i32
    return %arg0, %c0_i32 : i32, i32
  }
  func.func @transform_7(%arg0: i32) -> (i32, i32) {
    %c0_i32 = arith.constant 0 : i32
    %c0_i32_0 = arith.constant 0 : i32
    return %arg0, %c0_i32 : i32, i32
  }
}

</mosaic_0001>

<bundles_post_ra>
// kernel: conv_network_forward.1
= control target key start
LH: loop header
LB: loop body
LE: loop exit
PB: predicated region body
PF: predicated region fallthrough
CT: control target
= control target key end

     0   :  { %13 = vsyncpa [#allocation3], 0  ;;  %s1564_s0 = inlined_call_operand.vmem [shape: f32[8,192], index: 0, kind: input, shape index: {}]   ;;  %s1565_s1 = inlined_call_operand.vmem [shape: f32[8,8], index: 1, kind: input, shape index: {}]   ;;  %s1566_s2 = inlined_call_operand.hbm [shape: bf16[192,256], index: 2, kind: input, shape index: {}]   ;;  %s1567_s3 = inlined_call_operand.hbm [shape: bf16[520,128], index: 3, kind: input, shape index: {}]   ;;  %s1568_s4 = inlined_call_operand.vmem [shape: f32[1,896], index: 4, kind: input, shape index: {}]   ;;  %s1569_s5 = inlined_call_operand.hbm [shape: bf16[256,256], index: 5, kind: input, shape index: {}]   ;;  %s1570_s6 = inlined_call_operand.vmem [shape: f32[8,128], index: 6, kind: output, shape index: {0}]   ;;  %s1571_s7 = inlined_call_operand.vmem [shape: bf16[8,256], index: 7, kind: output, shape index: {1}]  }
   0x1   :  { %14 = vsyncpa [#allocation5], 0  ;;  %s36_s26 = sshll.u32 %s1567_s3, 4  ;;  %s1476_s27 = smov [#allocation4]   ;;  %s37_s26 = int_to_ptr.hbm [resolvable:$true] %s36_s26 }
   0x2   :  { %s38_s28 = sshll.u32 %s1476_s27, 4  ;;  %s23_s8 = sshll.u32 %s1566_s2, 4  ;;  %s39_s28 = int_to_ptr.vmem [resolvable:$true] %s38_s28  ;;  %s24_s8 = int_to_ptr.hbm [resolvable:$true] %s23_s8 }
   0x3   :  { %s1477_s9 = smov 64   ;;  %s1478_s10 = smov 4  }
   0x4   :  { %44 = dma.hbm_to_vmem [thread:$0]  %s37_s26, 4160, %s39_s28, [#allocation5], %s1477_s9, %s1477_s9, %s1478_s10  }
   0x5   :  { %s1479_s11 = smov [#allocation2]   ;;  %s1480_s13 = smov 128  }
   0x6   :  { %s25_s12 = sshll.u32 %s1479_s11, 4  ;;  %s1481_s14 = smov 8   ;;  %s26_s12 = int_to_ptr.vmem [resolvable:$true] %s25_s12 }
   0x7   :  { %31 = dma.hbm_to_vmem [thread:$0]  %s24_s8, 3072, %s26_s12, [#allocation3], %s1480_s13, %s1480_s13, %s1481_s14  }
   0x8   :  { %s51_s16 = sshll.u32 %s1569_s5, 4  ;;  %s1482_s17 = smov [#allocation6]   ;;  %s52_s16 = int_to_ptr.hbm [resolvable:$true] %s51_s16 }
   0x9   :  { %s53_s18 = sshll.u32 %s1482_s17, 4  ;;  %s54_s18 = int_to_ptr.vmem [resolvable:$true] %s53_s18 }
   0xa   :  { %59 = dma.hbm_to_vmem [thread:$0]  %s52_s16, 4096, %s54_s18, [#allocation5], %s1480_s13, %s1480_s13, %s1481_s14  }
   0xb   :  { %1472 = dma.done.wait [#allocation3], 3072  }
   0xc   :  { %1473 = vsyncadd [#allocation3], 4294964224 }
   0xd   :  { %1474 = dma.done.wait [#allocation5], 8256  }
   0xe   :  { %1475 = vsyncadd [#allocation5], 4294959040  ;;  %v995_v0 = vld [vmem:[#allocation2 + $0x70] sm:$0xf]  ;;  %v1309_v1 = vld [vmem:[#allocation2 + $0x74] sm:$0xf0] }
   0xf   :  { %v1308_v2 = vld [vmem:[#allocation2 + $0x74] sm:$0xf]  ;;  %v996_v3 = vor.u32 %v1309_v1, %v995_v0  ;;  %v997_v4 = vld [vmem:[#allocation2 + $0x78] sm:$0xf0]  ;;  %v987_v5 = vld [vmem:[#allocation2 + $0x60] sm:$0xf] }
  0x10   :  { %v1307_v6 = vld [vmem:[#allocation2 + $0x64] sm:$0xf0]  ;;  %v1000_v7 = vor.u32 %v1308_v2, %v997_v4  ;;  %v1306_v8 = vld [vmem:[#allocation2 + $0x64] sm:$0xf]  ;;  %v989_v9 = vld [vmem:[#allocation2 + $0x68] sm:$0xf0] }
  0x11   :  { %235 = vmatpush.bf16.msra.mxu0 %v996_v3  ;;  %v988_v10 = vor.u32 %v1307_v6, %v987_v5  ;;  %v979_v11 = vld [vmem:[#allocation2 + $0x50] sm:$0xf]  ;;  %v992_v12 = vor.u32 %v1306_v8, %v989_v9  ;;  %v1305_v13 = vld [vmem:[#allocation2 + $0x54] sm:$0xf0]  ;;  %v1316_v14 = vld [vmem:[#allocation2 + $0xb4] sm:$0xf] }
  0x12   :  { %261 = vmatpush.bf16.msra.mxu2 %v1000_v7  ;;  %v1029_v15 = vld [vmem:[#allocation2 + $0xb8] sm:$0xf0]  ;;  %v1304_v16 = vld [vmem:[#allocation2 + $0x54] sm:$0xf]  ;;  %v1314_v19 = vld [vmem:[#allocation2 + $0xa4] sm:$0xf]  ;;  %v980_v21 = vor.u32 %v1305_v13, %v979_v11 }
  0x13   :  { %v981_v17 = vld [vmem:[#allocation2 + $0x58] sm:$0xf0]  ;;  %v1032_v18 = vor.u32 %v1316_v14, %v1029_v15  ;;  %v1021_v20 = vld [vmem:[#allocation2 + $0xa8] sm:$0xf0]  ;;  %v971_v22 = vld [vmem:[#allocation2 + $0x40] sm:$0xf] }
  0x14   :  { %v1303_v23 = vld [vmem:[#allocation2 + $0x44] sm:$0xf0]  ;;  %v1024_v24 = vor.u32 %v1314_v19, %v1021_v20  ;;  %v984_v25 = vor.u32 %v1304_v16, %v981_v17  ;;  %v1027_v26 = vld [vmem:[#allocation2 + $0xb0] sm:$0xf]  ;;  %v1317_v27 = vld [vmem:[#allocation2 + $0xb4] sm:$0xf0] }
  0x15   :  { %236 = vmatpush.bf16.msra.mxu0 %v988_v10  ;;  %278 = vmatpush.bf16.msra.mxu3 %v1032_v18  ;;  %v1312_v28 = vld [vmem:[#allocation2 + $0x94] sm:$0xf]  ;;  %v1302_v29 = vld [vmem:[#allocation2 + $0x44] sm:$0xf]  ;;  %v973_v30 = vld [vmem:[#allocation2 + $0x48] sm:$0xf0]  ;;  %v1028_v31 = vor.u32 %v1317_v27, %v1027_v26  ;;  %v972_v34 = vor.u32 %v1303_v23, %v971_v22 }
  0x16   :  { %262 = vmatpush.bf16.msra.mxu2 %v992_v12  ;;  %v1013_v32 = vld [vmem:[#allocation2 + $0x98] sm:$0xf0]  ;;  %v1019_v33 = vld [vmem:[#allocation2 + $0xa0] sm:$0xf]  ;;  %v963_v35 = vld [vmem:[#allocation2 + $0x30] sm:$0xf]  ;;  %v976_v38 = vor.u32 %v1302_v29, %v973_v30 }
  0x17   :  { %v1016_v36 = vor.u32 %v1312_v28, %v1013_v32  ;;  %v1315_v37 = vld [vmem:[#allocation2 + $0xa4] sm:$0xf0]  ;;  %v1301_v39 = vld [vmem:[#allocation2 + $0x34] sm:$0xf0]  ;;  %252 = vmatpush.bf16.msra.mxu1 %v1028_v31  ;;  %v1310_v41 = vld [vmem:[#allocation2 + $0x84] sm:$0xf] }
  0x18   :  { %v1020_v40 = vor.u32 %v1315_v37, %v1019_v33  ;;  %v1005_v42 = vld [vmem:[#allocation2 + $0x88] sm:$0xf0]  ;;  %v1300_v43 = vld [vmem:[#allocation2 + $0x34] sm:$0xf]  ;;  %v965_v44 = vld [vmem:[#allocation2 + $0x38] sm:$0xf0]  ;;  %v964_v47 = vor.u32 %v1301_v39, %v963_v35 }
  0x19   :  { %237 = vmatpush.bf16.msra.mxu0 %v980_v21  ;;  %279 = vmatpush.bf16.msra.mxu3 %v1024_v24  ;;  %v1011_v45 = vld [vmem:[#allocation2 + $0x90] sm:$0xf]  ;;  %v1313_v46 = vld [vmem:[#allocation2 + $0x94] sm:$0xf0]  ;;  %v1008_v48 = vor.u32 %v1310_v41, %v1005_v42  ;;  %v79_v49 = vld [vmem:[%s1564_s0 + $0x8] sm:$0xff]  ;;  %v968_v50 = vor.u32 %v1300_v43, %v965_v44  ;;  %vm231_vm0 = vcmask 523264  }
  0x1a   :  { %263 = vmatpush.bf16.msra.mxu2 %v984_v25  ;;  %v955_v51 = vld [vmem:[#allocation2 + $0x20] sm:$0xf]  ;;  %v1299_v52 = vld [vmem:[#allocation2 + $0x24] sm:$0xf0]  ;;  %v1298_v53 = vld [vmem:[#allocation2 + $0x24] sm:$0xf]  ;;  %v1012_v54 = vor.u32 %v1313_v46, %v1011_v45  ;;  %v81_v58 = vpack.c.bf16 %v79_v49, %v79_v49 }
  0x1b   :  { %253 = vmatpush.bf16.msra.mxu1 %v1020_v40  ;;  %v957_v55 = vld [vmem:[#allocation2 + $0x28] sm:$0xf0]  ;;  %v1003_v56 = vld [vmem:[#allocation2 + $0x80] sm:$0xf]  ;;  %v1311_v57 = vld [vmem:[#allocation2 + $0x84] sm:$0xf0]  ;;  %v956_v61 = vor.u32 %v1299_v52, %v955_v51 }
  0x1c   :  { %v1157_v59 = vld [vmem:[#allocation6 + $0xf0] sm:$0xf]  ;;  %v1349_v60 = vld [vmem:[#allocation6 + $0xf4] sm:$0xf0]  ;;  %v1149_v63 = vld [vmem:[#allocation6 + $0xe0] sm:$0xf]  ;;  %v960_v1 = vor.u32 %v1298_v53, %v957_v55  ;;  %v1004_v4 = vor.u32 %v1311_v57, %v1003_v56 }
  0x1d   :  { %238 = vmatpush.bf16.msra.mxu0 %v972_v34  ;;  %280 = vmatpush.bf16.msra.mxu3 %v1016_v36  ;;  %v1158_v62 = vor.u32 %v1349_v60, %v1157_v59  ;;  %v1347_v0 = vld [vmem:[#allocation6 + $0xe4] sm:$0xf0]  ;;  %v947_v2 = vld [vmem:[#allocation2 + $0x10] sm:$0xf]  ;;  %v1297_v3 = vld [vmem:[#allocation2 + $0x14] sm:$0xf0] }
  0x1e   :  { %264 = vmatpush.bf16.msra.mxu2 %v976_v38  ;;  %v1296_v5 = vld [vmem:[#allocation2 + $0x14] sm:$0xf]  ;;  %v949_v6 = vld [vmem:[#allocation2 + $0x18] sm:$0xf0]  ;;  %v1150_v7 = vor.u32 %v1347_v0, %v1149_v63  ;;  %v948_v12 = vor.u32 %v1297_v3, %v947_v2  ;;  %v939_v13 = vld [vmem:[#allocation2] sm:$0xf] }
  0x1f   :  { %254 = vmatpush.bf16.msra.mxu1 %v1012_v54  ;;  %v1141_v8 = vld [vmem:[#allocation6 + $0xd0] sm:$0xf]  ;;  %v1345_v9 = vld [vmem:[#allocation6 + $0xd4] sm:$0xf0]  ;;  %v1295_v14 = vld [vmem:[#allocation2 + $0x4] sm:$0xf0]  ;;  %v952_v17 = vor.u32 %v1296_v5, %v949_v6 }
  0x20   :  { %v1093_v10 = vld [vmem:[#allocation6 + $0x70] sm:$0xf]  ;;  %v1333_v11 = vld [vmem:[#allocation6 + $0x74] sm:$0xf0]  ;;  %v1294_v15 = vld [vmem:[#allocation2 + $0x4] sm:$0xf]  ;;  %v1142_v22 = vor.u32 %v1345_v9, %v1141_v8  ;;  %v940_v29 = vor.u32 %v1295_v14, %v939_v13 }
  0x21   :  { %239 = vmatpush.bf16.msra.mxu0 %v964_v47  ;;  %281 = vmatpush.bf16.msra.mxu3 %v1008_v48  ;;  %v1094_v16 = vor.u32 %v1333_v11, %v1093_v10  ;;  %v941_v18 = vld [vmem:[#allocation2 + $0x8] sm:$0xf0]  ;;  %v1332_v19 = vld [vmem:[#allocation6 + $0x74] sm:$0xf]  ;;  %v1085_v20 = vld [vmem:[#allocation6 + $0x60] sm:$0xf] }
  0x22   :  { %265 = vmatpush.bf16.msra.mxu2 %v968_v50  ;;  %v1095_v21 = vld [vmem:[#allocation6 + $0x78] sm:$0xf0]  ;;  %v1133_v23 = vld [vmem:[#allocation6 + $0xc0] sm:$0xf]  ;;  %v1331_v24 = vld [vmem:[#allocation6 + $0x64] sm:$0xf0]  ;;  %v944_v33 = vor.u32 %v1294_v15, %v941_v18 }
  0x23   :  { %255 = vmatpush.bf16.msra.mxu1 %v1004_v4  ;;  %v1343_v25 = vld [vmem:[#allocation6 + $0xc4] sm:$0xf0]  ;;  %v1348_v26 = vld [vmem:[#allocation6 + $0xf4] sm:$0xf]  ;;  %v1159_v27 = vld [vmem:[#allocation6 + $0xf8] sm:$0xf0]  ;;  %v1086_v28 = vor.u32 %v1331_v24, %v1085_v20  ;;  %v1098_v34 = vor.u32 %v1332_v19, %v1095_v21 }
  0x24   :  { %1034 = vmatmul.msk.bf16.vlgmr.msra.gmra.mxu3 %vm231_vm0, %v81_v58  ;;  %v78_v30 = vld [vmem:[%s1564_s0] sm:$0xff]  ;;  %v1077_v31 = vld [vmem:[#allocation6 + $0x50] sm:$0xf]  ;;  %v1329_v32 = vld [vmem:[#allocation6 + $0x54] sm:$0xf0]  ;;  %v1134_v37 = vor.u32 %v1343_v25, %v1133_v23  ;;  %v1162_v38 = vor.u32 %v1348_v26, %v1159_v27  ;;  %vm619_vm1 = vcmask 1043456  }
  0x25   :  { %501 = vmatpush.bf16.msrb.mxu3 %v1158_v62  ;;  %240 = vmatpush.bf16.msra.mxu0 %v956_v61  ;;  %v1330_v35 = vld [vmem:[#allocation6 + $0x64] sm:$0xf]  ;;  %v1087_v36 = vld [vmem:[#allocation6 + $0x68] sm:$0xf0]  ;;  %v1125_v39 = vld [vmem:[#allocation6 + $0xb0] sm:$0xf]  ;;  %v80_v40 = vpack.c.bf16 %v78_v30, %v78_v30  ;;  %v1078_v44 = vor.u32 %v1329_v32, %v1077_v31 }
  0x26   :  { %266 = vmatpush.bf16.msra.mxu2 %v960_v1  ;;  %1033 = vmatmul.msk.bf16.vlgmr.msra.gmra.mxu1 %vm231_vm0, %v81_v58  ;;  %v1341_v41 = vld [vmem:[#allocation6 + $0xb4] sm:$0xf0]  ;;  %v1346_v42 = vld [vmem:[#allocation6 + $0xe4] sm:$0xf]  ;;  %v1151_v43 = vld [vmem:[#allocation6 + $0xe8] sm:$0xf0]  ;;  %v1090_v47 = vor.u32 %v1330_v35, %v1087_v36 }
  0x27   :  { %488 = vmatpush.bf16.msrb.mxu1 %v1094_v16  ;;  %v1069_v45 = vld [vmem:[#allocation6 + $0x40] sm:$0xf]  ;;  %v1327_v46 = vld [vmem:[#allocation6 + $0x44] sm:$0xf0]  ;;  %v1328_v48 = vld [vmem:[#allocation6 + $0x54] sm:$0xf]  ;;  %v1126_v50 = vor.u32 %v1341_v41, %v1125_v39  ;;  %v1154_v51 = vor.u32 %v1346_v42, %v1151_v43 }
  0x28   :  { %v1079_v49 = vld [vmem:[#allocation6 + $0x58] sm:$0xf0]  ;;  %v1117_v52 = vld [vmem:[#allocation6 + $0xa0] sm:$0xf]  ;;  %v1339_v53 = vld [vmem:[#allocation6 + $0xa4] sm:$0xf0]  ;;  %v1070_v56 = vor.u32 %v1327_v46, %v1069_v45 }
  0x29   :  { %502 = vmatpush.bf16.msrb.mxu3 %v1150_v7  ;;  %241 = vmatpush.bf16.msra.mxu0 %v948_v12  ;;  %v1344_v54 = vld [vmem:[#allocation6 + $0xd4] sm:$0xf]  ;;  %v1143_v55 = vld [vmem:[#allocation6 + $0xd8] sm:$0xf0]  ;;  %v1061_v57 = vld [vmem:[#allocation6 + $0x30] sm:$0xf]  ;;  %v1082_v59 = vor.u32 %v1328_v48, %v1079_v49  ;;  %v1118_v62 = vor.u32 %v1339_v53, %v1117_v52 }
  0x2a   :  { %267 = vmatpush.bf16.msra.mxu2 %v952_v17  ;;  %v1325_v58 = vld [vmem:[#allocation6 + $0x34] sm:$0xf0]  ;;  %v1326_v60 = vld [vmem:[#allocation6 + $0x44] sm:$0xf]  ;;  %v1071_v61 = vld [vmem:[#allocation6 + $0x48] sm:$0xf0]  ;;  %v1146_v63 = vor.u32 %v1344_v54, %v1143_v55 }
  0x2b   :  { %489 = vmatpush.bf16.msrb.mxu1 %v1086_v28  ;;  %v1109_v0 = vld [vmem:[#allocation6 + $0x90] sm:$0xf]  ;;  %v1337_v1 = vld [vmem:[#allocation6 + $0x94] sm:$0xf0]  ;;  %v1342_v2 = vld [vmem:[#allocation6 + $0xc4] sm:$0xf]  ;;  %v1062_v4 = vor.u32 %v1325_v58, %v1061_v57  ;;  %v1074_v5 = vor.u32 %v1326_v60, %v1071_v61 }
  0x2c   :  { %v1135_v3 = vld [vmem:[#allocation6 + $0xc8] sm:$0xf0]  ;;  %v1324_v6 = vld [vmem:[#allocation6 + $0x34] sm:$0xf]  ;;  %v1063_v7 = vld [vmem:[#allocation6 + $0x38] sm:$0xf0]  ;;  %v1110_v8 = vor.u32 %v1337_v1, %v1109_v0 }
  0x2d   :  { %503 = vmatpush.bf16.msrb.mxu3 %v1142_v22  ;;  %242 = vmatpush.bf16.msra.mxu0 %v940_v29  ;;  %v1138_v9 = vor.u32 %v1342_v2, %v1135_v3  ;;  %v1101_v10 = vld [vmem:[#allocation6 + $0x80] sm:$0xf]  ;;  %v1335_v11 = vld [vmem:[#allocation6 + $0x84] sm:$0xf0]  ;;  %v1066_v12 = vor.u32 %v1324_v6, %v1063_v7  ;;  %v1322_v13 = vld [vmem:[#allocation6 + $0x24] sm:$0xf] }
  0x2e   :  { %268 = vmatpush.bf16.msra.mxu2 %v944_v33  ;;  %v1055_v14 = vld [vmem:[#allocation6 + $0x28] sm:$0xf0]  ;;  %v1102_v15 = vor.u32 %v1335_v11, %v1101_v10  ;;  %v1320_v17 = vld [vmem:[#allocation6 + $0x14] sm:$0xf]  ;;  %v1047_v18 = vld [vmem:[#allocation6 + $0x18] sm:$0xf0] }
  0x2f   :  { %490 = vmatpush.bf16.msrb.mxu1 %v1078_v44  ;;  %v1058_v16 = vor.u32 %v1322_v13, %v1055_v14  ;;  %v1050_v19 = vor.u32 %v1320_v17, %v1047_v18  ;;  %v1318_v20 = vld [vmem:[#allocation6 + $0x4] sm:$0xf]  ;;  %v1039_v21 = vld [vmem:[#allocation6 + $0x8] sm:$0xf0]  ;;  %v1365_v23 = vld [vmem:[#allocation4 + $0x78] sm:$0xff]  ;;  %vm615_vm2 = vcmask 64512  }
  0x30   :  { %243 = vmatmul.bf16.vlgmr.msra.gmra.mxu0 %v80_v40  ;;  %v1042_v22 = vor.u32 %v1318_v20, %v1039_v21  ;;  %v1364_v24 = vld [vmem:[#allocation4 + $0x70] sm:$0xff]  ;;  %v1340_v25 = vld [vmem:[#allocation6 + $0xb4] sm:$0xf]  ;;  %v1127_v26 = vld [vmem:[#allocation6 + $0xb8] sm:$0xf0] }
  0x31   :  { %514 = vmatpush.bf16.msrb.mxu0 %v1098_v34  ;;  %504 = vmatpush.bf16.msrb.mxu3 %v1134_v37  ;;  %v1130_v27 = vor.u32 %v1340_v25, %v1127_v26  ;;  %v1357_v28 = vld [vmem:[#allocation4 + $0x38] sm:$0xff]  ;;  %v1053_v29 = vld [vmem:[#allocation6 + $0x20] sm:$0xf]  ;;  %v1323_v30 = vld [vmem:[#allocation6 + $0x24] sm:$0xf0] }
  0x32   :  { %527 = vmatpush.bf16.msrb.mxu2 %v1162_v38  ;;  %v1054_v31 = vor.u32 %v1323_v30, %v1053_v29  ;;  %v1363_v32 = vld [vmem:[#allocation4 + $0x68] sm:$0xff]  ;;  %v1119_v34 = vld [vmem:[#allocation6 + $0xa8] sm:$0xf0]  ;;  %v1045_v37 = vld [vmem:[#allocation6 + $0x10] sm:$0xf] }
  0x33   :  { %269 = vmatmul.bf16.vlgmr.msra.gmra.mxu2 %v80_v40  ;;  %491 = vmatpush.bf16.msrb.mxu1 %v1070_v56  ;;  %v1338_v33 = vld [vmem:[#allocation6 + $0xa4] sm:$0xf]  ;;  %v1356_v36 = vld [vmem:[#allocation4 + $0x30] sm:$0xff]  ;;  %v1321_v38 = vld [vmem:[#allocation6 + $0x14] sm:$0xf0] }
  0x34   :  { %v1122_v35 = vor.u32 %v1338_v33, %v1119_v34  ;;  %v1046_v39 = vor.u32 %v1321_v38, %v1045_v37  ;;  %v1362_v40 = vld [vmem:[#allocation4 + $0x60] sm:$0xff]  ;;  %v1336_v41 = vld [vmem:[#allocation6 + $0x94] sm:$0xf]  ;;  %v1355_v44 = vld [vmem:[#allocation4 + $0x28] sm:$0xff] }
  0x35   :  { %515 = vmatpush.bf16.msrb.mxu0 %v1090_v47  ;;  %505 = vmatpush.bf16.msrb.mxu3 %v1126_v50  ;;  %v1111_v42 = vld [vmem:[#allocation6 + $0x98] sm:$0xf0]  ;;  %v1037_v45 = vld [vmem:[#allocation6] sm:$0xf]  ;;  %v1319_v46 = vld [vmem:[#allocation6 + $0x4] sm:$0xf0] }
  0x36   :  { %528 = vmatpush.bf16.msrb.mxu2 %v1154_v51  ;;  %v1114_v43 = vor.u32 %v1336_v41, %v1111_v42  ;;  %v1038_v47 = vor.u32 %v1319_v46, %v1037_v45  ;;  %v1361_v48 = vld [vmem:[#allocation4 + $0x58] sm:$0xff]  ;;  %v1334_v49 = vld [vmem:[#allocation6 + $0x84] sm:$0xf]  ;;  %v1103_v50 = vld [vmem:[#allocation6 + $0x88] sm:$0xf0] }
  0x37   :  { %492 = vmatpush.bf16.msrb.mxu1 %v1062_v4  ;;  %v1106_v51 = vor.u32 %v1334_v49, %v1103_v50  ;;  %v1354_v52 = vld [vmem:[#allocation4 + $0x20] sm:$0xff]  ;;  %v1360_v53 = vld [vmem:[#allocation4 + $0x50] sm:$0xff]  ;;  %v1353_v54 = vld [vmem:[#allocation4 + $0x18] sm:$0xff] }
  0x38   :  { %v1359_v55 = vld [vmem:[#allocation4 + $0x48] sm:$0xff]  ;;  %v614_v56 = vld [vmem:[#allocation4 + $0x80] sm:$0xf]  ;;  %v1352_v57 = vld [vmem:[#allocation4 + $0x10] sm:$0xff] }
  0x39   :  { %516 = vmatpush.bf16.msrb.mxu0 %v1082_v59  ;;  %506 = vmatpush.bf16.msrb.mxu3 %v1118_v62  ;;  %v621_v58 = vsel %vm619_vm1, %v614_v56, 0  ;;  %v1358_v59 = vld [vmem:[#allocation4 + $0x40] sm:$0xff]  ;;  %v1351_v60 = vld [vmem:[#allocation4 + $0x8] sm:$0xff]  ;;  %v1372_v20 = vld [vmem:[#allocation4 + $0xb4] sm:$0xff] }
  0x3a   :  { %529 = vmatpush.bf16.msrb.mxu2 %v1146_v63  ;;  %v1350_v62 = vld [vmem:[#allocation4] sm:$0xff]  ;;  %v1371_v21 = vld [vmem:[#allocation4 + $0xac] sm:$0xff]  ;;  %v1380_v45 = vld [vmem:[#allocation4 + $0xf4] sm:$0xff] }
  0x3b   :  { %493 = vmatpush.bf16.msrb.mxu1 %v1054_v31  ;;  %v73_v63 = vld [vmem:[%s1568_s4] sm:$0x3]  ;;  %v1366_v29 = vld [vmem:[#allocation4 + $0x84] sm:$0xff] }
  0x3c   :  { %v107_v1 = vperm.slane %v73_v63, 0  ;;  %v108_v7 = vperm.slane %v73_v63, 1  ;;  %v580_v17 = vld [vmem:[%s1565_s1] sm:$0xff] }
  0x3d   :  { %517 = vmatpush.bf16.msrb.mxu0 %v1074_v5  ;;  %507 = vmatpush.bf16.msrb.mxu3 %v1110_v8  ;;  %v581_v18 = vpack.c.bf16 %v580_v17, %v580_v17 }
  0x3e   :  { %530 = vmatpush.bf16.msrb.mxu2 %v1138_v9 }
  0x3f   :  { %494 = vmatpush.bf16.msrb.mxu1 %v1046_v39 }
  0x41   :  { %518 = vmatpush.bf16.msrb.mxu0 %v1066_v12  ;;  %508 = vmatpush.bf16.msrb.mxu3 %v1102_v15 }
  0x42   :  { %531 = vmatpush.bf16.msrb.mxu2 %v1130_v27  ;;  %v1367_v27 = vld [vmem:[#allocation4 + $0x8c] sm:$0xff] }
  0x43   :  { %495 = vmatpush.bf16.msrb.mxu1 %v1038_v47 }
  0x45   :  { %519 = vmatpush.bf16.msrb.mxu0 %v1058_v16  ;;  %732 = vmatpush.bf16.msra.mxu3 %v1357_v28  ;;  %v77_v28 = vld [vmem:[%s1568_s4 + $0x5] sm:$0x3] }
  0x46   :  { %532 = vmatpush.bf16.msrb.mxu2 %v1122_v35  ;;  %v325_v30 = vperm.slane %v77_v28, 1  ;;  %v324_v31 = vperm.slane %v77_v28, 0 }
  0x47   :  { %630 = vmatpush.bf16.msra.mxu1 %v621_v58 }
  0x49   :  { %520 = vmatpush.bf16.msrb.mxu0 %v1050_v19  ;;  %733 = vmatpush.bf16.msra.mxu3 %v1356_v36  ;;  %v1373_v19 = vld [vmem:[#allocation4 + $0xbc] sm:$0xff] }
  0x4a   :  { %533 = vmatpush.bf16.msrb.mxu2 %v1114_v43 }
  0x4d   :  { %521 = vmatpush.bf16.msrb.mxu0 %v1042_v22  ;;  %734 = vmatpush.bf16.msra.mxu3 %v1355_v44  ;;  %v1370_v22 = vld [vmem:[#allocation4 + $0xa4] sm:$0xff] }
  0x4e   :  { %534 = vmatpush.bf16.msrb.mxu2 %v1106_v51 }
  0x51   :  { %745 = vmatpush.bf16.msra.mxu0 %v1365_v23  ;;  %735 = vmatpush.bf16.msra.mxu3 %v1354_v52  ;;  %v1369_v23 = vld [vmem:[#allocation4 + $0x9c] sm:$0xff] }
  0x55   :  { %746 = vmatpush.bf16.msra.mxu0 %v1364_v24  ;;  %736 = vmatpush.bf16.msra.mxu3 %v1353_v54  ;;  %v1368_v24 = vld [vmem:[#allocation4 + $0x94] sm:$0xff]  ;;  %v1378_v54 = vld [vmem:[#allocation4 + $0xe4] sm:$0xff] }
  0x59   :  { %747 = vmatpush.bf16.msra.mxu0 %v1363_v32  ;;  %737 = vmatpush.bf16.msra.mxu3 %v1352_v57  ;;  %v1377_v57 = vld [vmem:[#allocation4 + $0xdc] sm:$0xff] }
  0x5d   :  { %748 = vmatpush.bf16.msra.mxu0 %v1362_v40  ;;  %738 = vmatpush.bf16.msra.mxu3 %v1351_v60  ;;  %v1381_v40 = vld [vmem:[#allocation4 + $0xfc] sm:$0xff] }
  0x5e   :  { %913 = vmatpush.bf16.msra.mxu2 %v1381_v40 }
  0x61   :  { %749 = vmatpush.bf16.msra.mxu0 %v1361_v48  ;;  %739 = vmatpush.bf16.msra.mxu3 %v1350_v62  ;;  %v1379_v48 = vld [vmem:[#allocation4 + $0xec] sm:$0xff]  ;;  %v1376_v62 = vld [vmem:[#allocation4 + $0xd4] sm:$0xff] }
  0x62   :  { %914 = vmatpush.bf16.msra.mxu2 %v1380_v45 }
  0x65   :  { %750 = vmatpush.bf16.msra.mxu0 %v1360_v53 }
  0x66   :  { %915 = vmatpush.bf16.msra.mxu2 %v1379_v48 }
  0x69   :  { %751 = vmatpush.bf16.msra.mxu0 %v1359_v55 }
  0x6a   :  { %916 = vmatpush.bf16.msra.mxu2 %v1378_v54 }
  0x6d   :  { %752 = vmatpush.bf16.msra.mxu0 %v1358_v59  ;;  %v1389_v59 = vld [vmem:[%s1568_s4 + $0x2] ss:$0 sm:$0xff] }
  0x6e   :  { %917 = vmatpush.bf16.msra.mxu2 %v1377_v57 }
  0x72   :  { %918 = vmatpush.bf16.msra.mxu2 %v1376_v62 }
  0xa3   :  { %v257_v61 = vpop.f32.mrf.mxu1 }
  0xa7   :  { %v283_v0 = vpop.f32.mrf.mxu3 }
  0xab   :  { %v259_v4 = vpop.f32.mrf.mxu1 }
  0xad   :  { %v244_v2 = vpop.f32.mrf.mxu0 }
  0xae   :  { %v245_v3 = vadd.f32 %v244_v2, %v107_v1 }
  0xaf   :  { %v285_v5 = vpop.f32.mrf.mxu3 }
  0xb0   :  { %v258_v6 = vadd.f32 %v257_v61, %v245_v3 }
  0xb2   :  { %v287_v8 = vmax.f32 %v258_v6, 0.0 }
  0xb4   :  { %v289_v9 = vpack.c.bf16 %v287_v8, %v287_v8 }
  0xb5   :  { %v246_v12 = vpop.f32.mrf.mxu0 }
  0xb6   :  { %v270_v10 = vpop.f32.mrf.mxu2  ;;  %522 = vmatmul.bf16.vlgmr.msrb.gmra.mxu0 %v289_v9  ;;  %496 = vmatmul.bf16.vlgmr.msrb.gmra.mxu1 %v289_v9 }
  0xb7   :  { %v271_v11 = vadd.f32 %v270_v10, %v108_v7  ;;  %831 = vmatpush.bf16.msrb.mxu1 %v1373_v19 }
  0xb9   :  { %v284_v13 = vadd.f32 %v283_v0, %v271_v11 }
  0xbb   :  { %v288_v14 = vmax.f32 %v284_v13, 0.0  ;;  %832 = vmatpush.bf16.msrb.mxu1 %v1372_v20 }
  0xbd   :  { %v290_v15 = vpack.c.bf16 %v288_v14, %v288_v14 }
  0xbe   :  { %v272_v16 = vpop.f32.mrf.mxu2 }
  0xbf   :  { %509 = vmatmul.bf16.vlgmr.msrb.gmra.mxu3 %v290_v15  ;;  %535 = vmatmul.bf16.vlgmr.msrb.gmra.mxu2 %v290_v15 }
  0xc0   :  { %833 = vmatpush.bf16.msrb.mxu1 %v1371_v21 }
  0xc4   :  { %834 = vmatpush.bf16.msrb.mxu1 %v1370_v22 }
  0xc6   :  { %753 = vmatmul.bf16.vlgmr.msra.gmra.mxu0 %v290_v15  ;;  %1165 = vmatmul.msk.bf16.vlgmr.msra.gmra.mxu1 %vm615_vm2, %v581_v18 }
  0xc8   :  { %835 = vmatpush.bf16.msrb.mxu1 %v1369_v23  ;;  %v1375_v23 = vld [vmem:[#allocation4 + $0xcc] sm:$0xff] }
  0xc9   :  { %919 = vmatpush.bf16.msra.mxu2 %v1375_v23 }
  0xcc   :  { %836 = vmatpush.bf16.msrb.mxu1 %v1368_v24  ;;  %v1374_v24 = vld [vmem:[#allocation4 + $0xc4] sm:$0xff] }
  0xcd   :  { %920 = vmatpush.bf16.msra.mxu2 %v1374_v24 }
  0xcf   :  { %740 = vmatmul.bf16.vlgmr.msra.gmra.mxu3 %v289_v9 }
  0xd0   :  { %837 = vmatpush.bf16.msrb.mxu1 %v1367_v27 }
  0xd4   :  { %838 = vmatpush.bf16.msrb.mxu1 %v1366_v29 }
 0x133   :  { %v523_v25 = vpop.f32.mrf.mxu0  ;;  %v497_v26 = vpop.f32.mrf.mxu1 }
 0x134   :  { %v524_v34 = vadd.f32 %v523_v25, %v325_v30  ;;  %v498_v35 = vadd.f32 %v497_v26, %v324_v31  ;;  %v1390_v25 = vld [vmem:[%s1568_s4 + $0x3] ss:$0 sm:$0xff]  ;;  %v1391_v31 = vld [vmem:[%s1568_s4 + $0x4] ss:$0 sm:$0xff] }
 0x13b   :  { %v525_v32 = vpop.f32.mrf.mxu0  ;;  %v499_v33 = vpop.f32.mrf.mxu1 }
 0x142   :  { %v510_v36 = vpop.f32.mrf.mxu3  ;;  %v536_v37 = vpop.f32.mrf.mxu2 }
 0x143   :  { %v511_v38 = vadd.f32 %v510_v36, %v498_v35  ;;  %v537_v39 = vadd.f32 %v536_v37, %v524_v34  ;;  %v754_v43 = vpop.f32.mrf.mxu0  ;;  %v632_v44 = vpop.f32.mrf.mxu1 }
 0x145   :  { %v1163_v41 = vmul.f32 -1.442695, %v511_v38  ;;  %v1164_v42 = vmul.f32 -1.442695, %v537_v39 }
 0x147   :  { %1392 = vpow2.f32 %v1163_v41 }
 0x148   :  { %1394 = vpow2.f32 %v1164_v42 }
 0x14a   :  { %v512_v46 = vpop.f32.mrf.mxu3  ;;  %v538_v47 = vpop.f32.mrf.mxu2 }
 0x14b   :  { %v756_v50 = vpop.f32.mrf.mxu0  ;;  %v634_v51 = vpop.f32.mrf.mxu1 }
 0x14d   :  { %v1393_v49 = vpop.eup %1392 }
 0x14e   :  { %v1395_v52 = vpop.eup %1394  ;;  %v546_v53 = vadd.f32 1.0, %v1393_v49 }
 0x14f   :  { %v547_v55 = vadd.f32 1.0, %v1395_v52 }
 0x150   :  { %1396 = vrcp.f32 %v546_v53  ;;  %v557_v5 = vand.u32 2147483647, %v546_v53  ;;  %v559_v6 = vand.u32 2147483648, %v546_v53  ;;  %vm553_vm5 = vweird.f32 %v546_v53 }
 0x151   :  { %1398 = vrcp.f32 %v547_v55  ;;  %v574_v10 = vand.u32 2147483648, %v547_v55  ;;  %v572_v13 = vand.u32 2147483647, %v547_v55  ;;  %vm568_vm7 = vweird.f32 %v547_v55 }
 0x152   :  { %v741_v56 = vpop.f32.mrf.mxu3  ;;  %v560_v15 = vor.u32 1.1754944e-38, %v559_v6  ;;  %vm558_vm8 = vcmp.eq.f32.partialorder %v557_v5, 8.507059e+37 }
 0x153   :  { %v742_v58 = vadd.f32 %v741_v56, %v632_v44  ;;  %v575_v18 = vor.u32 1.1754944e-38, %v574_v10  ;;  %vm573_vm10 = vcmp.eq.f32.partialorder %v572_v13, 8.507059e+37 }
 0x155   :  { %v755_v60 = vadd.f32 %v754_v43, %v742_v58 }
 0x156   :  { %v1397_v61 = vpop.eup %1396 }
 0x157   :  { %v1399_v63 = vpop.eup %1398  ;;  %v549_v0 = vmul.f32 %v1397_v61, %v546_v53  ;;  %v761_v1 = vadd.f32 %v1389_v59, %v755_v60  ;;  %vm554_vm3 = vweird.f32 %v1397_v61 }
 0x158   :  { %v564_v2 = vmul.f32 %v1399_v63, %v547_v55  ;;  %vm569_vm4 = vweird.f32 %v1399_v63  ;;  %vm555_vm6 = vmor %vm553_vm5, %vm554_vm3 }
 0x159   :  { %v550_v3 = vsub.f32 1.0, %v549_v0  ;;  %v762_v4 = vmax.f32 %v761_v1, 0.0  ;;  %vm570_vm9 = vmor %vm568_vm7, %vm569_vm4 }
 0x15a   :  { %v565_v7 = vsub.f32 1.0, %v564_v2  ;;  %v743_v8 = vpop.f32.mrf.mxu3 }
 0x15b   :  { %v551_v9 = vmul.f32 %v1397_v61, %v550_v3  ;;  %v763_v11 = vpack.c.bf16 %v762_v4, %v762_v4 }
 0x15c   :  { %v566_v12 = vmul.f32 %v1399_v63, %v565_v7 }
 0x15d   :  { %v552_v14 = vadd.f32 %v1397_v61, %v551_v9  ;;  %839 = vmatmul.bf16.vlgmr.msrb.gmra.mxu1 %v763_v11 }
 0x15e   :  { %v567_v16 = vadd.f32 %v1399_v63, %v566_v12 }
 0x15f   :  { %v556_v17 = vsel %vm555_vm6, %v1397_v61, %v552_v14 }
 0x160   :  { %v561_v19 = vsel %vm558_vm8, %v560_v15, %v556_v17  ;;  %v571_v20 = vsel %vm570_vm9, %v1399_v63, %v567_v16 }
 0x161   :  { %v576_v21 = vsel %vm573_vm10, %v575_v18, %v571_v20 }
 0x162   :  { %v578_v22 = vpack.c.bf16 %v576_v21, %v561_v19 }
 0x164   :  { %579 = vst [vmem:[%s1571_s7] sm:$0xff] %v578_v22 }
 0x1da   :  { %v840_v26 = vpop.f32.mrf.mxu1 }
 0x1db   :  { %v841_v27 = vadd.f32 %v1390_v25, %v840_v26 }
 0x1dd   :  { %v844_v28 = vmax.f32 %v841_v27, 0.0 }
 0x1df   :  { %v845_v29 = vpack.c.bf16 %v844_v28, %v844_v28 }
 0x1e1   :  { %921 = vmatmul.bf16.vlgmr.msra.gmra.mxu2 %v845_v29 }
 0x1e2   :  { %v842_v30 = vpop.f32.mrf.mxu1 }
 0x264   :  { %v922_v32 = vpop.f32.mrf.mxu2 }
 0x265   :  { %v923_v33 = vadd.f32 %v1391_v31, %v922_v32 }
 0x267   :  { %926 = vst [vmem:[%s1570_s6] sm:$0xff] %v923_v33 }
 0x26c   :  { %v924_v34 = vpop.f32.mrf.mxu2 }
 0x26d   :  { %935 = vsyncpa [#allocation3], 1 }
 0x26e   :  { %936 = vsyncpa [#allocation5], 1 }

</bundles_post_ra>
